<compile_context>
chip_gen: v6e
topology: v6e:2x2x1
jax: 0.10.0
libtpu: 0.0.40
codegen_flags: <defaults>
</compile_context>

<pallas_src>
import functools

import jax
import jax.numpy as jnp
from jax.experimental import pallas as pl
from jax.experimental.pallas import tpu as pltpu

BN_EPS = 1e-5


def _round_up(x, m):
    return (x + m - 1) // m * m


def _pick_b_tile(n, max_tile=8):
    t = min(n, max_tile)
    while n % t:
        t -= 1
    return t


# ------------------------------ fused kernel -------------------------------

def _make_fused_block_kernel(H, W, Cin, Cout, KS, B_TILE, S_BLK, HEAD, cdt):
    pad = KS // 2
    GAP = S_BLK - H                        # zero rows between stacked images
    M_MM = (B_TILE - 1) * S_BLK + H        # matmul M rows (last image only needs H)

    def kernel(x_ref, w1_ref, w2_ref, s1_ref, h1_ref, s2_ref, h2_ref,
               out_ref, xp1, xp2):
        # --- zero ONLY the padding rows (head + per-image gap).  Done every grid
        #     step so the kernel stays correct when the batch axis is sharded
        #     across TensorCores (megacore "parallel").
        if HEAD:
            xp1[pl.ds(0, HEAD), :] = jnp.zeros((HEAD, W * Cin), jnp.float32)
            xp2[pl.ds(0, HEAD), :] = jnp.zeros((HEAD, W * Cout), jnp.float32)
        if GAP:
            gz1 = jnp.zeros((GAP, W * Cin), jnp.float32)
            gz2 = jnp.zeros((GAP, W * Cout), jnp.float32)
            for b in range(B_TILE):
                base = HEAD + b * S_BLK
                xp1[pl.ds(base + H, GAP), :] = gz1
                xp2[pl.ds(base + H, GAP), :] = gz2

        # --- 3x3 conv as KS fat matmuls over all stacked images.  H zero padding
        #     comes from the head/gap rows; W zero padding is folded into the
        #     banded weight so K = W*Cin exactly.  Accumulator starts from tap 0.
        def conv3x1(xp, w_ref):
            acc = jnp.dot(xp[pl.ds(HEAD - pad, M_MM), :].astype(cdt), w_ref[0],
                          preferred_element_type=jnp.float32)
            for kh in range(1, KS):
                acc = acc + jnp.dot(
                    xp[pl.ds(HEAD - pad + kh, M_MM), :].astype(cdt), w_ref[kh],
                    preferred_element_type=jnp.float32)
            return acc                                     # (M_MM, W*Cout) f32

        # ---- layer 1: ReLU -> BN1 -> padded interior writes -> Conv1 -----------
        for b in range(B_TILE):
            xb = x_ref[b].astype(jnp.float32)              # (H, W*Cin), lane-dense
            xp1[pl.ds(HEAD + b * S_BLK, H), :] = (
                jnp.maximum(xb, 0.0) * s1_ref[...] + h1_ref[...])
        y = conv3x1(xp1, w1_ref)

        # ---- layer 2: ReLU -> BN2 -> padded interior writes -> Conv2 -----------
        for b in range(B_TILE):
            yb = y[b * S_BLK:b * S_BLK + H, :]             # aligned value slice
            xp2[pl.ds(HEAD + b * S_BLK, H), :] = (
                jnp.maximum(yb, 0.0) * s2_ref[...] + h2_ref[...])
        z = conv3x1(xp2, w2_ref)

        # ---- residual add in f32, lane-dense per-image stores -------------------
        for b in range(B_TILE):
            out_ref[b] = (z[b * S_BLK:b * S_BLK + H, :]
                          + x_ref[b].astype(jnp.float32)).astype(out_ref.dtype)

    return kernel


# ------------------------------ wrapper helpers -----------------------------

def _banded_weight(w_hwio, W, pad, dtype):
    """(KS,KS,Cin,Cout) HWIO conv weight -> KS block-banded (W*Cin, W*Cout) mats.

    y[r, wo*Cout+co] = sum_kh xp[r+kh-pad, :] @ wb[kh] reproduces a stride-1,
    pad=`pad` conv: kw taps + channel contraction merge into one fat K dim and the
    W zero padding is realized by dropping out-of-range taps (K = W*Cin exactly).
    """
    KS, _, Cin, Cout = w_hwio.shape
    wi = jnp.arange(W)[:, None]                 # input column
    wo = jnp.arange(W)[None, :]                 # output column
    kw = wi - wo + pad                          # tap connecting wi -> wo
    valid = ((kw >= 0) & (kw < KS)).astype(w_hwio.dtype)
    kw_c = jnp.clip(kw, 0, KS - 1)
    wb = w_hwio[:, kw_c, :, :] * valid[None, :, :, None, None]   # (KS,W,W,Cin,Cout)
    wb = jnp.transpose(wb, (0, 1, 3, 2, 4))                      # (KS,W,Cin,W,Cout)
    return wb.reshape(KS, W * Cin, W * Cout).astype(dtype)


def _bn_affine(gamma, beta, mean, var, W, eps=BN_EPS):
    """Per-channel inference BN folded to lane-dense (1, W*C) scale/shift."""
    inv_std = 1.0 / jnp.sqrt(var.astype(jnp.float32) + eps)
    scale = gamma.astype(jnp.float32) * inv_std
    shift = beta.astype(jnp.float32) - mean.astype(jnp.float32) * scale
    return (jnp.tile(scale, W).reshape(1, -1),
            jnp.tile(shift, W).reshape(1, -1))


def _invariant_spec(block_shape, index_map):
    """Grid-invariant operand: request single buffering (halves its VMEM footprint,
    matters most under v7x's 64 MiB VMEM).  Falls back to a plain BlockSpec if this
    JAX build's BlockSpec does not take pipeline_mode."""
    try:
        return pl.BlockSpec(block_shape, index_map,
                            pipeline_mode=pl.Buffered(buffer_count=1))
    except Exception:
        return pl.BlockSpec(block_shape, index_map)


def basic_block_forward(x_nchw, params, compute_dtype=jnp.bfloat16, b_tile=None):
    """BasicBlock.forward with downsample=None, stride=1 (so ni == nf)."""
    N, C, H, W = x_nchw.shape
    KS = params["w1"].shape[0]
    pad = KS // 2
    Cout = params["w1"].shape[-1]
    assert Cout == C, "residual add requires ni == nf"

    B_TILE = b_tile if b_tile is not None else _pick_b_tile(N)
    assert N % B_TILE == 0
    S_BLK = _round_up(H + 2 * pad, 8)   # per-image row stride in the padded scratch
    HEAD = _round_up(pad, 8)            # zero rows above image 0 (keeps stores aligned)
    TOTAL = HEAD + B_TILE * S_BLK

    # Lane-folded NHWC: (N, H, W*C).  At the test shape W*C = 128, so every VPU op,
    # every store and the matmul K dim are exactly one lane tile.
    x2d = jnp.transpose(x_nchw, (0, 2, 3, 1)).reshape(N, H, W * C)

    w1b = _banded_weight(params["w1"], W, pad, compute_dtype)
    w2b = _banded_weight(params["w2"], W, pad, compute_dtype)
    s1, h1 = _bn_affine(params["g1"], params["b1"], params["m1"], params["v1"], W)
    s2, h2 = _bn_affine(params["g2"], params["b2"], params["m2"], params["v2"], W)

    kernel = _make_fused_block_kernel(H, W, C, Cout, KS, B_TILE, S_BLK, HEAD,
                                      compute_dtype)

    out2d = pl.pallas_call(
        kernel,
        out_shape=jax.ShapeDtypeStruct((N, H, W * Cout), x_nchw.dtype),
        grid=(N // B_TILE,),
        in_specs=[
            pl.BlockSpec((B_TILE, H, W * C), lambda n: (n, 0, 0)),
            _invariant_spec((KS, W * C, W * Cout), lambda n: (0, 0, 0)),
            _invariant_spec((KS, W * Cout, W * Cout), lambda n: (0, 0, 0)),
            _invariant_spec((1, W * C), lambda n: (0, 0)),
            _invariant_spec((1, W * C), lambda n: (0, 0)),
            _invariant_spec((1, W * Cout), lambda n: (0, 0)),
            _invariant_spec((1, W * Cout), lambda n: (0, 0)),
        ],
        out_specs=pl.BlockSpec((B_TILE, H, W * Cout), lambda n: (n, 0, 0)),
        scratch_shapes=[
            # f32 scratches keep 8-row store alignment even when the MXU operands
            # are bf16 (tap slices are cast right at the matmul feed).
            pltpu.VMEM((TOTAL, W * C), jnp.float32),       # padded act for conv1
            pltpu.VMEM((TOTAL, W * Cout), jnp.float32),    # padded act for conv2
        ],
        compiler_params=pltpu.CompilerParams(
            dimension_semantics=("parallel",)),
    )(x2d, w1b, w2b, s1, h1, s2, h2)

    return jnp.transpose(out2d.reshape(N, H, W, Cout), (0, 3, 1, 2))


# --------------------------- pure-JAX reference -----------------------------

def ref_forward(x_nchw, params, compute_dtype=jnp.float32):
    """Reference.  `compute_dtype` rounds the conv operands exactly as the kernel
    does (bf16 MXU operands, f32 accumulation), so the bf16 path can be checked
    against a like-for-like baseline with a tight tolerance."""
    pad = params["w1"].shape[0] // 2

    def q(v):
        return v.astype(compute_dtype).astype(jnp.float32)

    def act_conv(y, w, g, b, m, v):
        inv_std = 1.0 / jnp.sqrt(v + BN_EPS)
        scale = g * inv_std
        shift = b - m * scale
        y = jnp.maximum(y, 0.0) * scale + shift
        return jax.lax.conv_general_dilated(
            q(y), q(w), window_strides=(1, 1), padding=((pad, pad), (pad, pad)),
            dimension_numbers=("NHWC", "HWIO", "NHWC"),
            preferred_element_type=jnp.float32)

    x = jnp.transpose(x_nchw, (0, 2, 3, 1)).astype(jnp.float32)
    identity = x
    y = act_conv(x, params["w1"], params["g1"], params["b1"], params["m1"], params["v1"])
    z = act_conv(y, params["w2"], params["g2"], params["b2"], params["m2"], params["v2"])
    out = z + identity
    return jnp.transpose(out, (0, 3, 1, 2)).astype(x_nchw.dtype)


# --------------------------------- params -----------------------------------

def init_params(key, ni, nf, ks=3, randomize_bn=False):
    k1, k2, k3 = jax.random.split(key, 3)
    # PyTorch Conv2d weights are (Cout, Cin, kh, kw); kernel uses HWIO.
    fan_in1 = ni * ks * ks
    fan_in2 = nf * ks * ks
    w1_oihw = jax.random.normal(k1, (nf, ni, ks, ks), jnp.float32) * (2.0 / fan_in1) ** 0.5
    w2_oihw = jax.random.normal(k2, (nf, nf, ks, ks), jnp.float32) * (2.0 / fan_in2) ** 0.5
    p = {
        "w1": jnp.transpose(w1_oihw, (2, 3, 1, 0)),   # HWIO
        "w2": jnp.transpose(w2_oihw, (2, 3, 1, 0)),
        # PyTorch init: BN1 weight=1 (conv_layer default), BN2 weight=0 (zero_bn);
        # biases and running stats are BatchNorm2d defaults.
        "g1": jnp.ones((ni,), jnp.float32),
        "b1": jnp.zeros((ni,), jnp.float32),
        "m1": jnp.zeros((ni,), jnp.float32),
        "v1": jnp.ones((ni,), jnp.float32),
        "g2": jnp.zeros((nf,), jnp.float32),
        "b2": jnp.zeros((nf,), jnp.float32),
        "m2": jnp.zeros((nf,), jnp.float32),
        "v2": jnp.ones((nf,), jnp.float32),
    }
    if randomize_bn:
        # Non-trivial BN params so both conv paths actually reach the output.
        kk = jax.random.split(k3, 8)
        p["g1"] = jax.random.normal(kk[0], (ni,), jnp.float32)
        p["b1"] = jax.random.normal(kk[1], (ni,), jnp.float32) * 0.1
        p["m1"] = jax.random.normal(kk[2], (ni,), jnp.float32) * 0.1
        p["v1"] = jax.random.uniform(kk[3], (ni,), jnp.float32, minval=0.5, maxval=1.5)
        p["g2"] = jax.random.normal(kk[4], (nf,), jnp.float32)
        p["b2"] = jax.random.normal(kk[5], (nf,), jnp.float32) * 0.1
        p["m2"] = jax.random.normal(kk[6], (nf,), jnp.float32) * 0.1
        p["v2"] = jax.random.uniform(kk[7], (nf,), jnp.float32, minval=0.5, maxval=1.5)
    return p


# ---------------------------------- main -------------------------------------

if __name__ == "__main__":
    key = jax.random.PRNGKey(0)
    kx, kp = jax.random.split(key)

    N, C, H, W = 2, 8, 16, 16          # ni == nf == 8, stride=1, downsample=None; W*C = 128
    x = jax.random.normal(kx, (N, C, H, W), jnp.float32)

    fwd_f32 = jax.jit(functools.partial(basic_block_forward, compute_dtype=jnp.float32))
    fwd_bf16 = jax.jit(functools.partial(basic_block_forward, compute_dtype=jnp.bfloat16))

    # Check 1: PyTorch default init (zero_bn on the second BN), f32 matmuls.
    p0 = init_params(kp, ni=C, nf=C, randomize_bn=False)
    out0 = jax.block_until_ready(fwd_f32(x, p0))
    ref0 = jax.block_until_ready(ref_forward(x, p0, jnp.float32))
    assert out0.shape == (N, C, H, W)
    assert jnp.allclose(out0, ref0, atol=1e-3, rtol=1e-3), \
        f"default-init f32 max abs err {jnp.max(jnp.abs(out0 - ref0))}"

    # Check 2: randomized BN params (both convs contribute), f32 matmuls.
    p1 = init_params(kp, ni=C, nf=C, randomize_bn=True)
    out1 = jax.block_until_ready(fwd_f32(x, p1))
    ref1 = jax.block_until_ready(ref_forward(x, p1, jnp.float32))
    assert jnp.allclose(out1, ref1, atol=1e-3, rtol=1e-3), \
        f"random-init f32 max abs err {jnp.max(jnp.abs(out1 - ref1))}"

    # Check 3: bf16 MXU operands (the fast / default path) against a reference that
    # rounds its conv operands to bf16 the same way (f32 accumulation both sides).
    out2 = jax.block_until_ready(fwd_bf16(x, p1))
    ref2 = jax.block_until_ready(ref_forward(x, p1, jnp.bfloat16))
    assert jnp.allclose(out2, ref2, atol=1e-2, rtol=1e-2), \
        f"random-init bf16 max abs err {jnp.max(jnp.abs(out2 - ref2))}"

    print("KERNEL_OK")
</pallas_src>

<mosaic_0001>
module attributes {stable_mosaic.version = 11 : i64} {
  func.func @kernel(%arg0: i32, %arg1: memref<2x16x128xf32, #tpu.memory_space<vmem>>, %arg2: memref<3x128x128xf32, #tpu.memory_space<vmem>>, %arg3: memref<3x128x128xf32, #tpu.memory_space<vmem>>, %arg4: memref<1x128xf32, #tpu.memory_space<vmem>>, %arg5: memref<1x128xf32, #tpu.memory_space<vmem>>, %arg6: memref<1x128xf32, #tpu.memory_space<vmem>>, %arg7: memref<1x128xf32, #tpu.memory_space<vmem>>, %arg8: memref<2x16x128xf32, #tpu.memory_space<vmem>>, %arg9: memref<56x128xf32, #tpu.memory_space<vmem>>, %arg10: memref<56x128xf32, #tpu.memory_space<vmem>>) attributes {dimension_semantics = [#tpu.dimension_semantics<parallel>], iteration_bounds = array<i64: 1>, scalar_prefetch = 0 : i64, scratch_operands = 2 : i64, tpu.core_type = #tpu.core_type<tc>, window_params = [{transform_indices = @transform_0, window_bounds = array<i64: 2, 16, 128>}, {pipeline_mode = #tpu.pipeline_mode<synchronous>, transform_indices = @transform_1, window_bounds = array<i64: 3, 128, 128>}, {pipeline_mode = #tpu.pipeline_mode<synchronous>, transform_indices = @transform_2, window_bounds = array<i64: 3, 128, 128>}, {pipeline_mode = #tpu.pipeline_mode<synchronous>, transform_indices = @transform_3, window_bounds = array<i64: 1, 128>}, {pipeline_mode = #tpu.pipeline_mode<synchronous>, transform_indices = @transform_4, window_bounds = array<i64: 1, 128>}, {pipeline_mode = #tpu.pipeline_mode<synchronous>, transform_indices = @transform_5, window_bounds = array<i64: 1, 128>}, {pipeline_mode = #tpu.pipeline_mode<synchronous>, transform_indices = @transform_6, window_bounds = array<i64: 1, 128>}, {transform_indices = @transform_7, window_bounds = array<i64: 2, 16, 128>}]} {
    %cst = arith.constant 0.000000e+00 : f32
    %0 = vector.broadcast %cst : f32 to vector<8x128xf32>
    %c0 = arith.constant 0 : index
    %c0_0 = arith.constant 0 : index
    %1 = vector.load %arg9[%c0, %c0_0] : memref<56x128xf32, #tpu.memory_space<vmem>>, vector<8x128xf32>
    tpu.vector_store %arg9[%c0, %c0_0], %0 {strides = array<i32>} : memref<56x128xf32, #tpu.memory_space<vmem>>, vector<8x128xf32>,
    %cst_1 = arith.constant 0.000000e+00 : f32
    %2 = vector.broadcast %cst_1 : f32 to vector<8x128xf32>
    %c0_2 = arith.constant 0 : index
    %c0_3 = arith.constant 0 : index
    %3 = vector.load %arg10[%c0_2, %c0_3] : memref<56x128xf32, #tpu.memory_space<vmem>>, vector<8x128xf32>
    tpu.vector_store %arg10[%c0_2, %c0_3], %2 {strides = array<i32>} : memref<56x128xf32, #tpu.memory_space<vmem>>, vector<8x128xf32>,
    %cst_4 = arith.constant 0.000000e+00 : f32
    %4 = vector.broadcast %cst_4 : f32 to vector<8x128xf32>
    %cst_5 = arith.constant 0.000000e+00 : f32
    %5 = vector.broadcast %cst_5 : f32 to vector<8x128xf32>
    %c24 = arith.constant 24 : index
    %c0_6 = arith.constant 0 : index
    %6 = vector.load %arg9[%c24, %c0_6] : memref<56x128xf32, #tpu.memory_space<vmem>>, vector<8x128xf32>
    tpu.vector_store %arg9[%c24, %c0_6], %4 {strides = array<i32>} : memref<56x128xf32, #tpu.memory_space<vmem>>, vector<8x128xf32>,
    %c24_7 = arith.constant 24 : index
    %c0_8 = arith.constant 0 : index
    %7 = vector.load %arg10[%c24_7, %c0_8] : memref<56x128xf32, #tpu.memory_space<vmem>>, vector<8x128xf32>
    tpu.vector_store %arg10[%c24_7, %c0_8], %5 {strides = array<i32>} : memref<56x128xf32, #tpu.memory_space<vmem>>, vector<8x128xf32>,
    %c48 = arith.constant 48 : index
    %c0_9 = arith.constant 0 : index
    %8 = vector.load %arg9[%c48, %c0_9] : memref<56x128xf32, #tpu.memory_space<vmem>>, vector<8x128xf32>
    tpu.vector_store %arg9[%c48, %c0_9], %4 {strides = array<i32>} : memref<56x128xf32, #tpu.memory_space<vmem>>, vector<8x128xf32>,
    %c48_10 = arith.constant 48 : index
    %c0_11 = arith.constant 0 : index
    %9 = vector.load %arg10[%c48_10, %c0_11] : memref<56x128xf32, #tpu.memory_space<vmem>>, vector<8x128xf32>
    tpu.vector_store %arg10[%c48_10, %c0_11], %5 {strides = array<i32>} : memref<56x128xf32, #tpu.memory_space<vmem>>, vector<8x128xf32>,
    %c0_12 = arith.constant 0 : index
    %c0_13 = arith.constant 0 : index
    %c0_14 = arith.constant 0 : index
    %10 = vector.load %arg1[%c0_12, %c0_13, %c0_14] : memref<2x16x128xf32, #tpu.memory_space<vmem>>, vector<1x16x128xf32>
    %11 = vector.shape_cast %10 : vector<1x16x128xf32> to vector<16x128xf32>
    %cst_15 = arith.constant 0.000000e+00 : f32
    %12 = vector.broadcast %cst_15 : f32 to vector<16x128xf32>
    %13 = arith.maximumf %11, %12 : vector<16x128xf32>
    %c0_16 = arith.constant 0 : index
    %c0_17 = arith.constant 0 : index
    %14 = vector.load %arg4[%c0_16, %c0_17] : memref<1x128xf32, #tpu.memory_space<vmem>>, vector<1x128xf32>
    %15 = vector.broadcast %14 : vector<1x128xf32> to vector<16x128xf32>
    %16 = arith.mulf %13, %15 : vector<16x128xf32>
    %c0_18 = arith.constant 0 : index
    %c0_19 = arith.constant 0 : index
    %17 = vector.load %arg5[%c0_18, %c0_19] : memref<1x128xf32, #tpu.memory_space<vmem>>, vector<1x128xf32>
    %18 = vector.broadcast %17 : vector<1x128xf32> to vector<16x128xf32>
    %19 = arith.addf %16, %18 : vector<16x128xf32>
    %c8 = arith.constant 8 : index
    %c0_20 = arith.constant 0 : index
    %20 = vector.load %arg9[%c8, %c0_20] : memref<56x128xf32, #tpu.memory_space<vmem>>, vector<16x128xf32>
    tpu.vector_store %arg9[%c8, %c0_20], %19 {strides = array<i32>} : memref<56x128xf32, #tpu.memory_space<vmem>>, vector<16x128xf32>,
    %c1 = arith.constant 1 : index
    %c0_21 = arith.constant 0 : index
    %c0_22 = arith.constant 0 : index
    %21 = vector.load %arg1[%c1, %c0_21, %c0_22] : memref<2x16x128xf32, #tpu.memory_space<vmem>>, vector<1x16x128xf32>
    %22 = vector.shape_cast %21 : vector<1x16x128xf32> to vector<16x128xf32>
    %cst_23 = arith.constant 0.000000e+00 : f32
    %23 = vector.broadcast %cst_23 : f32 to vector<16x128xf32>
    %24 = arith.maximumf %22, %23 : vector<16x128xf32>
    %c0_24 = arith.constant 0 : index
    %c0_25 = arith.constant 0 : index
    %25 = vector.load %arg4[%c0_24, %c0_25] : memref<1x128xf32, #tpu.memory_space<vmem>>, vector<1x128xf32>
    %26 = vector.broadcast %25 : vector<1x128xf32> to vector<16x128xf32>
    %27 = arith.mulf %24, %26 : vector<16x128xf32>
    %c0_26 = arith.constant 0 : index
    %c0_27 = arith.constant 0 : index
    %28 = vector.load %arg5[%c0_26, %c0_27] : memref<1x128xf32, #tpu.memory_space<vmem>>, vector<1x128xf32>
    %29 = vector.broadcast %28 : vector<1x128xf32> to vector<16x128xf32>
    %30 = arith.addf %27, %29 : vector<16x128xf32>
    %c32 = arith.constant 32 : index
    %c0_28 = arith.constant 0 : index
    %31 = vector.load %arg9[%c32, %c0_28] : memref<56x128xf32, #tpu.memory_space<vmem>>, vector<16x128xf32>
    tpu.vector_store %arg9[%c32, %c0_28], %30 {strides = array<i32>} : memref<56x128xf32, #tpu.memory_space<vmem>>, vector<16x128xf32>,
    %c7 = arith.constant 7 : index
    %c0_29 = arith.constant 0 : index
    %32 = vector.load %arg9[%c7, %c0_29] : memref<56x128xf32, #tpu.memory_space<vmem>>, vector<40x128xf32>
    %c0_30 = arith.constant 0 : index
    %c0_31 = arith.constant 0 : index
    %c0_32 = arith.constant 0 : index
    %33 = vector.load %arg2[%c0_30, %c0_31, %c0_32] : memref<3x128x128xf32, #tpu.memory_space<vmem>>, vector<1x128x128xf32>
    %34 = vector.shape_cast %33 : vector<1x128x128xf32> to vector<128x128xf32>
    %cst_33 = arith.constant dense<0.000000e+00> : vector<40x128xf32>
    %35 = tpu.matmul %32, %34, %cst_33 {dimension_numbers = #tpu.dot_dimension_numbers<[1], [0], [0], [1], [0, 0, 1, 1], [], []>} : vector<40x128xf32>, vector<128x128xf32>, vector<40x128xf32> -> vector<40x128xf32>
    %c8_34 = arith.constant 8 : index
    %c0_35 = arith.constant 0 : index
    %36 = vector.load %arg9[%c8_34, %c0_35] : memref<56x128xf32, #tpu.memory_space<vmem>>, vector<40x128xf32>
    %c1_36 = arith.constant 1 : index
    %c0_37 = arith.constant 0 : index
    %c0_38 = arith.constant 0 : index
    %37 = vector.load %arg2[%c1_36, %c0_37, %c0_38] : memref<3x128x128xf32, #tpu.memory_space<vmem>>, vector<1x128x128xf32>
    %38 = vector.shape_cast %37 : vector<1x128x128xf32> to vector<128x128xf32>
    %cst_39 = arith.constant dense<0.000000e+00> : vector<40x128xf32>
    %39 = tpu.matmul %36, %38, %cst_39 {dimension_numbers = #tpu.dot_dimension_numbers<[1], [0], [0], [1], [0, 0, 1, 1], [], []>} : vector<40x128xf32>, vector<128x128xf32>, vector<40x128xf32> -> vector<40x128xf32>
    %40 = arith.addf %35, %39 : vector<40x128xf32>
    %c9 = arith.constant 9 : index
    %c0_40 = arith.constant 0 : index
    %41 = vector.load %arg9[%c9, %c0_40] : memref<56x128xf32, #tpu.memory_space<vmem>>, vector<40x128xf32>
    %c2 = arith.constant 2 : index
    %c0_41 = arith.constant 0 : index
    %c0_42 = arith.constant 0 : index
    %42 = vector.load %arg2[%c2, %c0_41, %c0_42] : memref<3x128x128xf32, #tpu.memory_space<vmem>>, vector<1x128x128xf32>
    %43 = vector.shape_cast %42 : vector<1x128x128xf32> to vector<128x128xf32>
    %cst_43 = arith.constant dense<0.000000e+00> : vector<40x128xf32>
    %44 = tpu.matmul %41, %43, %cst_43 {dimension_numbers = #tpu.dot_dimension_numbers<[1], [0], [0], [1], [0, 0, 1, 1], [], []>} : vector<40x128xf32>, vector<128x128xf32>, vector<40x128xf32> -> vector<40x128xf32>
    %45 = arith.addf %40, %44 : vector<40x128xf32>
    %46 = vector.extract_strided_slice %45 {offsets = [0, 0], sizes = [16, 128], strides = [1, 1]} : vector<40x128xf32> to vector<16x128xf32>
    %cst_44 = arith.constant 0.000000e+00 : f32
    %47 = vector.broadcast %cst_44 : f32 to vector<16x128xf32>
    %48 = arith.maximumf %46, %47 : vector<16x128xf32>
    %c0_45 = arith.constant 0 : index
    %c0_46 = arith.constant 0 : index
    %49 = vector.load %arg6[%c0_45, %c0_46] : memref<1x128xf32, #tpu.memory_space<vmem>>, vector<1x128xf32>
    %50 = vector.broadcast %49 : vector<1x128xf32> to vector<16x128xf32>
    %51 = arith.mulf %48, %50 : vector<16x128xf32>
    %c0_47 = arith.constant 0 : index
    %c0_48 = arith.constant 0 : index
    %52 = vector.load %arg7[%c0_47, %c0_48] : memref<1x128xf32, #tpu.memory_space<vmem>>, vector<1x128xf32>
    %53 = vector.broadcast %52 : vector<1x128xf32> to vector<16x128xf32>
    %54 = arith.addf %51, %53 : vector<16x128xf32>
    %c8_49 = arith.constant 8 : index
    %c0_50 = arith.constant 0 : index
    %55 = vector.load %arg10[%c8_49, %c0_50] : memref<56x128xf32, #tpu.memory_space<vmem>>, vector<16x128xf32>
    tpu.vector_store %arg10[%c8_49, %c0_50], %54 {strides = array<i32>} : memref<56x128xf32, #tpu.memory_space<vmem>>, vector<16x128xf32>,
    %56 = vector.extract_strided_slice %45 {offsets = [24, 0], sizes = [16, 128], strides = [1, 1]} : vector<40x128xf32> to vector<16x128xf32>
    %cst_51 = arith.constant 0.000000e+00 : f32
    %57 = vector.broadcast %cst_51 : f32 to vector<16x128xf32>
    %58 = arith.maximumf %56, %57 : vector<16x128xf32>
    %c0_52 = arith.constant 0 : index
    %c0_53 = arith.constant 0 : index
    %59 = vector.load %arg6[%c0_52, %c0_53] : memref<1x128xf32, #tpu.memory_space<vmem>>, vector<1x128xf32>
    %60 = vector.broadcast %59 : vector<1x128xf32> to vector<16x128xf32>
    %61 = arith.mulf %58, %60 : vector<16x128xf32>
    %c0_54 = arith.constant 0 : index
    %c0_55 = arith.constant 0 : index
    %62 = vector.load %arg7[%c0_54, %c0_55] : memref<1x128xf32, #tpu.memory_space<vmem>>, vector<1x128xf32>
    %63 = vector.broadcast %62 : vector<1x128xf32> to vector<16x128xf32>
    %64 = arith.addf %61, %63 : vector<16x128xf32>
    %c32_56 = arith.constant 32 : index
    %c0_57 = arith.constant 0 : index
    %65 = vector.load %arg10[%c32_56, %c0_57] : memref<56x128xf32, #tpu.memory_space<vmem>>, vector<16x128xf32>
    tpu.vector_store %arg10[%c32_56, %c0_57], %64 {strides = array<i32>} : memref<56x128xf32, #tpu.memory_space<vmem>>, vector<16x128xf32>,
    %c7_58 = arith.constant 7 : index
    %c0_59 = arith.constant 0 : index
    %66 = vector.load %arg10[%c7_58, %c0_59] : memref<56x128xf32, #tpu.memory_space<vmem>>, vector<40x128xf32>
    %c0_60 = arith.constant 0 : index
    %c0_61 = arith.constant 0 : index
    %c0_62 = arith.constant 0 : index
    %67 = vector.load %arg3[%c0_60, %c0_61, %c0_62] : memref<3x128x128xf32, #tpu.memory_space<vmem>>, vector<1x128x128xf32>
    %68 = vector.shape_cast %67 : vector<1x128x128xf32> to vector<128x128xf32>
    %cst_63 = arith.constant dense<0.000000e+00> : vector<40x128xf32>
    %69 = tpu.matmul %66, %68, %cst_63 {dimension_numbers = #tpu.dot_dimension_numbers<[1], [0], [0], [1], [0, 0, 1, 1], [], []>} : vector<40x128xf32>, vector<128x128xf32>, vector<40x128xf32> -> vector<40x128xf32>
    %c8_64 = arith.constant 8 : index
    %c0_65 = arith.constant 0 : index
    %70 = vector.load %arg10[%c8_64, %c0_65] : memref<56x128xf32, #tpu.memory_space<vmem>>, vector<40x128xf32>
    %c1_66 = arith.constant 1 : index
    %c0_67 = arith.constant 0 : index
    %c0_68 = arith.constant 0 : index
    %71 = vector.load %arg3[%c1_66, %c0_67, %c0_68] : memref<3x128x128xf32, #tpu.memory_space<vmem>>, vector<1x128x128xf32>
    %72 = vector.shape_cast %71 : vector<1x128x128xf32> to vector<128x128xf32>
    %cst_69 = arith.constant dense<0.000000e+00> : vector<40x128xf32>
    %73 = tpu.matmul %70, %72, %cst_69 {dimension_numbers = #tpu.dot_dimension_numbers<[1], [0], [0], [1], [0, 0, 1, 1], [], []>} : vector<40x128xf32>, vector<128x128xf32>, vector<40x128xf32> -> vector<40x128xf32>
    %74 = arith.addf %69, %73 : vector<40x128xf32>
    %c9_70 = arith.constant 9 : index
    %c0_71 = arith.constant 0 : index
    %75 = vector.load %arg10[%c9_70, %c0_71] : memref<56x128xf32, #tpu.memory_space<vmem>>, vector<40x128xf32>
    %c2_72 = arith.constant 2 : index
    %c0_73 = arith.constant 0 : index
    %c0_74 = arith.constant 0 : index
    %76 = vector.load %arg3[%c2_72, %c0_73, %c0_74] : memref<3x128x128xf32, #tpu.memory_space<vmem>>, vector<1x128x128xf32>
    %77 = vector.shape_cast %76 : vector<1x128x128xf32> to vector<128x128xf32>
    %cst_75 = arith.constant dense<0.000000e+00> : vector<40x128xf32>
    %78 = tpu.matmul %75, %77, %cst_75 {dimension_numbers = #tpu.dot_dimension_numbers<[1], [0], [0], [1], [0, 0, 1, 1], [], []>} : vector<40x128xf32>, vector<128x128xf32>, vector<40x128xf32> -> vector<40x128xf32>
    %79 = arith.addf %74, %78 : vector<40x128xf32>
    %80 = vector.extract_strided_slice %79 {offsets = [0, 0], sizes = [16, 128], strides = [1, 1]} : vector<40x128xf32> to vector<16x128xf32>
    %c0_76 = arith.constant 0 : index
    %c0_77 = arith.constant 0 : index
    %c0_78 = arith.constant 0 : index
    %81 = vector.load %arg1[%c0_76, %c0_77, %c0_78] : memref<2x16x128xf32, #tpu.memory_space<vmem>>, vector<1x16x128xf32>
    %82 = vector.shape_cast %81 : vector<1x16x128xf32> to vector<16x128xf32>
    %83 = arith.addf %80, %82 : vector<16x128xf32>
    %c0_79 = arith.constant 0 : index
    %c0_80 = arith.constant 0 : index
    %c0_81 = arith.constant 0 : index
    %84 = vector.load %arg8[%c0_79, %c0_80, %c0_81] : memref<2x16x128xf32, #tpu.memory_space<vmem>>, vector<1x16x128xf32>
    %85 = vector.shape_cast %84 : vector<1x16x128xf32> to vector<16x128xf32>
    %86 = vector.shape_cast %83 : vector<16x128xf32> to vector<1x16x128xf32>
    tpu.vector_store %arg8[%c0_79, %c0_80, %c0_81], %86 {strides = array<i32>} : memref<2x16x128xf32, #tpu.memory_space<vmem>>, vector<1x16x128xf32>,
    %87 = vector.extract_strided_slice %79 {offsets = [24, 0], sizes = [16, 128], strides = [1, 1]} : vector<40x128xf32> to vector<16x128xf32>
    %c1_82 = arith.constant 1 : index
    %c0_83 = arith.constant 0 : index
    %c0_84 = arith.constant 0 : index
    %88 = vector.load %arg1[%c1_82, %c0_83, %c0_84] : memref<2x16x128xf32, #tpu.memory_space<vmem>>, vector<1x16x128xf32>
    %89 = vector.shape_cast %88 : vector<1x16x128xf32> to vector<16x128xf32>
    %90 = arith.addf %87, %89 : vector<16x128xf32>
    %c1_85 = arith.constant 1 : index
    %c0_86 = arith.constant 0 : index
    %c0_87 = arith.constant 0 : index
    %91 = vector.load %arg8[%c1_85, %c0_86, %c0_87] : memref<2x16x128xf32, #tpu.memory_space<vmem>>, vector<1x16x128xf32>
    %92 = vector.shape_cast %91 : vector<1x16x128xf32> to vector<16x128xf32>
    %93 = vector.shape_cast %90 : vector<16x128xf32> to vector<1x16x128xf32>
    tpu.vector_store %arg8[%c1_85, %c0_86, %c0_87], %93 {strides = array<i32>} : memref<2x16x128xf32, #tpu.memory_space<vmem>>, vector<1x16x128xf32>,
    return
  }
  func.func @transform_0(%arg0: i32) -> (i32, i32, i32) {
    %c0_i32 = arith.constant 0 : i32
    %c0_i32_0 = arith.constant 0 : i32
    %c0_i32_1 = arith.constant 0 : i32
    return %arg0, %c0_i32, %c0_i32_0 : i32, i32, i32
  }
  func.func @transform_1(%arg0: i32) -> (i32, i32, i32) {
    %c0_i32 = arith.constant 0 : i32
    %c0_i32_0 = arith.constant 0 : i32
    %c0_i32_1 = arith.constant 0 : i32
    %c0_i32_2 = arith.constant 0 : i32
    return %c0_i32, %c0_i32_0, %c0_i32_1 : i32, i32, i32
  }
  func.func @transform_2(%arg0: i32) -> (i32, i32, i32) {
    %c0_i32 = arith.constant 0 : i32
    %c0_i32_0 = arith.constant 0 : i32
    %c0_i32_1 = arith.constant 0 : i32
    %c0_i32_2 = arith.constant 0 : i32
    return %c0_i32, %c0_i32_0, %c0_i32_1 : i32, i32, i32
  }
  func.func @transform_3(%arg0: i32) -> (i32, i32) {
    %c0_i32 = arith.constant 0 : i32
    %c0_i32_0 = arith.constant 0 : i32
    %c0_i32_1 = arith.constant 0 : i32
    return %c0_i32, %c0_i32_0 : i32, i32
  }
  func.func @transform_4(%arg0: i32) -> (i32, i32) {
    %c0_i32 = arith.constant 0 : i32
    %c0_i32_0 = arith.constant 0 : i32
    %c0_i32_1 = arith.constant 0 : i32
    return %c0_i32, %c0_i32_0 : i32, i32
  }
  func.func @transform_5(%arg0: i32) -> (i32, i32) {
    %c0_i32 = arith.constant 0 : i32
    %c0_i32_0 = arith.constant 0 : i32
    %c0_i32_1 = arith.constant 0 : i32
    return %c0_i32, %c0_i32_0 : i32, i32
  }
  func.func @transform_6(%arg0: i32) -> (i32, i32) {
    %c0_i32 = arith.constant 0 : i32
    %c0_i32_0 = arith.constant 0 : i32
    %c0_i32_1 = arith.constant 0 : i32
    return %c0_i32, %c0_i32_0 : i32, i32
  }
  func.func @transform_7(%arg0: i32) -> (i32, i32, i32) {
    %c0_i32 = arith.constant 0 : i32
    %c0_i32_0 = arith.constant 0 : i32
    %c0_i32_1 = arith.constant 0 : i32
    return %arg0, %c0_i32, %c0_i32_0 : i32, i32, i32
  }
}

</mosaic_0001>

<bundles_post_ra>
// kernel: tile.23
= control target key start
LH: loop header
LB: loop body
LE: loop exit
PB: predicated region body
PF: predicated region fallthrough
CT: control target
= control target key end

     0   :  { %s28_s0 = inlined_call_operand.vmem [shape: f32[8], index: 0, kind: input, shape index: {}]   ;;  %s29_s1 = inlined_call_operand.vmem [shape: f32[16,8], index: 1, kind: output, shape index: {}]  }
   0x1   :  { %v4_v0 = vld [vmem:[%s28_s0] ss:$0 sm:$0xff] }
   0x2   :  { %5 = vst [vmem:[%s29_s1] sm:$0xff] %v4_v0  ;;  %8 = vst [vmem:[%s29_s1 + $0x8] sm:$0xff] %v4_v0 }

// kernel: tile.24
= control target key start
LH: loop header
LB: loop body
LE: loop exit
PB: predicated region body
PF: predicated region fallthrough
CT: control target
= control target key end

     0   :  { %s133_s10 = smov 120   ;;  %s134_s11 = smov 104   ;;  %vm3_vm0 = vcmask 64512   ;;  %vm9_vm1 = vcmask 1048512   ;;  %vm15_vm2 = vcmask 982912   ;;  %vm21_vm3 = vcmask 917312   ;;  %s209_s0 = inlined_call_operand.vmem [shape: f32[16,8], index: 0, kind: input, shape index: {}]   ;;  %s210_s1 = inlined_call_operand.vmem [shape: f32[1,128], index: 1, kind: output, shape index: {}]  }
   0x1   :  { %v103_v0 = vld [vmem:[%s209_s0 + $0xf] sm:$0x1]   ;;  %v105_v1 = vld [vmem:[%s209_s0 + $0xd] sm:$0x1]   ;;  %v104_v2 = vld [vmem:[%s209_s0 + $0xe] sm:$0x1]  }
   0x2   :  { %7 = vrot.lane.b32.xlu0 %v103_v0, %s133_s10  ;;  %19 = vrot.lane.b32.xlu1 %v105_v1, %s134_s11  ;;  %v106_v3 = vld [vmem:[%s209_s0 + $0xc] sm:$0x1]   ;;  %s135_s16 = smov 112   ;;  %s136_s17 = smov 96   ;;  %v107_v4 = vld [vmem:[%s209_s0 + $0xb] sm:$0x1]  }
   0x3   :  { %v108_v5 = vld [vmem:[%s209_s0 + $0xa] sm:$0x1]   ;;  %v2_v6 = vld [vmem:[%s209_s0] sm:$0x1]   ;;  %s137_s24 = smov 88   ;;  %s138_s25 = smov 80  }
   0x4   :  { %4 = vst.msk [vmem:[#allocation0] sm:$0x1] %vm3_vm0, %v2_v6   ;;  %v109_v7 = vld [vmem:[%s209_s0 + $0x9] sm:$0x1]   ;;  %v110_v8 = vld [vmem:[%s209_s0 + $0x8] sm:$0x1]  }
   0x5   :  { %s139_s30 = smov 72   ;;  %s140_s2 = smov 64   ;;  %v111_v9 = vld [vmem:[%s209_s0 + $0x7] sm:$0x1]   ;;  %v112_v10 = vld [vmem:[%s209_s0 + $0x6] sm:$0x1]  }
   0x6   :  { %13 = vrot.lane.b32.xlu0 %v104_v2, %s135_s16  ;;  %25 = vrot.lane.b32.xlu1 %v106_v3, %s136_s17  ;;  %s141_s7 = smov 56   ;;  %s142_s8 = smov 48   ;;  %v113_v11 = vld [vmem:[%s209_s0 + $0x5] sm:$0x1]   ;;  %v114_v12 = vld [vmem:[%s209_s0 + $0x4] sm:$0x1]  }
   0x7   :  { %s143_s13 = smov 40   ;;  %s144_s14 = smov 32   ;;  %v115_v13 = vld [vmem:[%s209_s0 + $0x3] sm:$0x1]   ;;  %v116_v14 = vld [vmem:[%s209_s0 + $0x2] sm:$0x1]  }
   0x8   :  { %s145_s19 = smov 24   ;;  %s146_s20 = smov 16   ;;  %v117_v15 = vld [vmem:[%s209_s0 + $0x1] sm:$0x1]   ;;  %vm27_vm4 = vcmask 851712   ;;  %vm33_vm5 = vcmask 786112  }
   0x9   :  { %s147_s0 = smov 8   ;;  %vm39_vm6 = vcmask 720512   ;;  %vm45_vm7 = vcmask 654912   ;;  %vm51_vm8 = vcmask 589312   ;;  %vm57_vm9 = vcmask 523712  }
   0xa   :  { %31 = vrot.lane.b32.xlu0 %v107_v4, %s137_s24  ;;  %37 = vrot.lane.b32.xlu1 %v108_v5, %s138_s25  ;;  %vm63_vm10 = vcmask 458112   ;;  %vm69_vm11 = vcmask 392512   ;;  %vm75_vm12 = vcmask 326912   ;;  %vm81_vm13 = vcmask 261312  }
   0xb   :  { %vm87_vm14 = vcmask 195712   ;;  %vm93_vm15 = vcmask 130112  }
   0xe   :  { %43 = vrot.lane.b32.xlu0 %v109_v7, %s139_s30  ;;  %49 = vrot.lane.b32.xlu1 %v110_v8, %s140_s2 }
  0x12   :  { %55 = vrot.lane.b32.xlu0 %v111_v9, %s141_s7  ;;  %61 = vrot.lane.b32.xlu1 %v112_v10, %s142_s8 }
  0x16   :  { %67 = vrot.lane.b32.xlu0 %v113_v11, %s143_s13  ;;  %73 = vrot.lane.b32.xlu1 %v114_v12, %s144_s14 }
  0x1a   :  { %79 = vrot.lane.b32.xlu0 %v115_v13, %s145_s19  ;;  %85 = vrot.lane.b32.xlu1 %v116_v14, %s146_s20 }
  0x1e   :  { %91 = vrot.lane.b32.xlu0 %v117_v15, %s147_s0 }
  0x74   :  { %v8_v16 = vpop.permute.xlu0 %7   ;;  %v20_v17 = vpop.permute.xlu1 %19  }
  0x75   :  { %10 = vst.msk [vmem:[#allocation0] sm:$0x1] %vm9_vm1, %v8_v16  }
  0x78   :  { %v14_v18 = vpop.permute.xlu0 %13   ;;  %v26_v19 = vpop.permute.xlu1 %25  }
  0x79   :  { %16 = vst.msk [vmem:[#allocation0] sm:$0x1] %vm15_vm2, %v14_v18  }
  0x7a   :  { %22 = vst.msk [vmem:[#allocation0] sm:$0x1] %vm21_vm3, %v20_v17  }
  0x7b   :  { %28 = vst.msk [vmem:[#allocation0] sm:$0x1] %vm27_vm4, %v26_v19  }
  0x7c   :  { %v32_v20 = vpop.permute.xlu0 %31   ;;  %v38_v21 = vpop.permute.xlu1 %37  }
  0x7d   :  { %34 = vst.msk [vmem:[#allocation0] sm:$0x1] %vm33_vm5, %v32_v20  }
  0x7e   :  { %40 = vst.msk [vmem:[#allocation0] sm:$0x1] %vm39_vm6, %v38_v21  }
  0x80   :  { %v44_v22 = vpop.permute.xlu0 %43   ;;  %v50_v23 = vpop.permute.xlu1 %49  }
  0x81   :  { %46 = vst.msk [vmem:[#allocation0] sm:$0x1] %vm45_vm7, %v44_v22  }
  0x82   :  { %52 = vst.msk [vmem:[#allocation0] sm:$0x1] %vm51_vm8, %v50_v23  }
  0x84   :  { %v56_v24 = vpop.permute.xlu0 %55   ;;  %v62_v25 = vpop.permute.xlu1 %61  }
  0x85   :  { %58 = vst.msk [vmem:[#allocation0] sm:$0x1] %vm57_vm9, %v56_v24  }
  0x86   :  { %64 = vst.msk [vmem:[#allocation0] sm:$0x1] %vm63_vm10, %v62_v25  }
  0x88   :  { %v68_v26 = vpop.permute.xlu0 %67   ;;  %v74_v27 = vpop.permute.xlu1 %73  }
  0x89   :  { %70 = vst.msk [vmem:[#allocation0] sm:$0x1] %vm69_vm11, %v68_v26  }
  0x8a   :  { %76 = vst.msk [vmem:[#allocation0] sm:$0x1] %vm75_vm12, %v74_v27  }
  0x8c   :  { %v80_v28 = vpop.permute.xlu0 %79   ;;  %v86_v29 = vpop.permute.xlu1 %85  }
  0x8d   :  { %82 = vst.msk [vmem:[#allocation0] sm:$0x1] %vm81_vm13, %v80_v28  }
  0x8e   :  { %88 = vst.msk [vmem:[#allocation0] sm:$0x1] %vm87_vm14, %v86_v29  }
  0x90   :  { %v92_v30 = vpop.permute.xlu0 %91  }
  0x91   :  { %94 = vst.msk [vmem:[#allocation0] sm:$0x1] %vm93_vm15, %v92_v30  }
  0x98   :  { %v99_v31 = vld [vmem:[#allocation0] sm:$0x1] }
  0x99   :  { %102 = vst [vmem:[%s210_s1] sm:$0x1] %v99_v31 }

// kernel: basic_block_forward.1
= control target key start
LH: loop header
LB: loop body
LE: loop exit
PB: predicated region body
PF: predicated region fallthrough
CT: control target
= control target key end

     0   :  { %v1302_v0 = vmov 0.0   ;;  %vm1303_vm0 = vmmov 0   ;;  %s1860_s1 = inlined_call_operand.vmem [shape: f32[3,128,128], index: 1, kind: input, shape index: {}]   ;;  %s1861_s0 = inlined_call_operand.vmem [shape: f32[2,16,128], index: 0, kind: input, shape index: {}]   ;;  %s1862_s3 = inlined_call_operand.vmem [shape: f32[1,128], index: 3, kind: input, shape index: {}]   ;;  %s1863_s4 = inlined_call_operand.vmem [shape: f32[1,128], index: 4, kind: input, shape index: {}]   ;;  %s1864_s2 = inlined_call_operand.vmem [shape: f32[3,128,128], index: 2, kind: input, shape index: {}]   ;;  %s1865_s5 = inlined_call_operand.vmem [shape: f32[1,128], index: 5, kind: input, shape index: {}]   ;;  %s1866_s6 = inlined_call_operand.vmem [shape: f32[1,128], index: 6, kind: input, shape index: {}]   ;;  %s1867_s7 = inlined_call_operand.vmem [shape: f32[2,16,128], index: 7, kind: output, shape index: {}]  }
   0x1   :  { %1018 = vmatprep.subr.mxu0 %v1302_v0  ;;  %26 = vst [vmem:[#allocation2] sm:$0xff] %v1302_v0  ;;  %27 = vst [vmem:[#allocation3] sm:$0xff] %v1302_v0  ;;  %v835_v1 = vld [vmem:[%s1860_s1 + $0xf8] sm:$0xff]  ;;  %1065 = vmatprep.subr.mxu1 %v1302_v0  ;;  %v834_v3 = vld [vmem:[%s1860_s1 + $0xf0] sm:$0xff] }
   0x2   :  { %28 = vst [vmem:[#allocation2 + $0x18] sm:$0xff] %v1302_v0  ;;  %29 = vst [vmem:[#allocation3 + $0x18] sm:$0xff] %v1302_v0  ;;  %v101_v2 = vld [vmem:[%s1860_s1 + $0x78] sm:$0xff]  ;;  %1019 = vmatpush3.msra.mxu0 %v835_v1  ;;  %v100_v4 = vld [vmem:[%s1860_s1 + $0x70] sm:$0xff]  ;;  %1050 = vmatprep.mubr.msk.f32.mxu0 %vm1303_vm0, %v1302_v0 }
   0x3   :  { %30 = vst [vmem:[#allocation2 + $0x30] sm:$0xff] %v1302_v0  ;;  %31 = vst [vmem:[#allocation3 + $0x30] sm:$0xff] %v1302_v0  ;;  %1066 = vmatpush3.msra.mxu1 %v101_v2  ;;  %1020 = vmatprep.subr.mxu0 %v1302_v0  ;;  %v833_v5 = vld [vmem:[%s1860_s1 + $0xe8] sm:$0xff]  ;;  %v832_v7 = vld [vmem:[%s1860_s1 + $0xe0] sm:$0xff] }
   0x4   :  { %1067 = vmatprep.subr.mxu1 %v1302_v0  ;;  %v99_v6 = vld [vmem:[%s1860_s1 + $0x68] sm:$0xff]  ;;  %1021 = vmatpush3.msra.mxu0 %v834_v3  ;;  %v98_v8 = vld [vmem:[%s1860_s1 + $0x60] sm:$0xff]  ;;  %v831_v9 = vld [vmem:[%s1860_s1 + $0xd8] sm:$0xff] }
   0x5   :  { %1068 = vmatpush3.msra.mxu1 %v100_v4  ;;  %1022 = vmatprep.subr.mxu0 %v1302_v0  ;;  %v97_v10 = vld [vmem:[%s1860_s1 + $0x58] sm:$0xff]  ;;  %v830_v11 = vld [vmem:[%s1860_s1 + $0xd0] sm:$0xff]  ;;  %v829_v13 = vld [vmem:[%s1860_s1 + $0xc8] sm:$0xff] }
   0x6   :  { %1069 = vmatprep.subr.mxu1 %v1302_v0  ;;  %1023 = vmatpush3.msra.mxu0 %v833_v5  ;;  %v96_v12 = vld [vmem:[%s1860_s1 + $0x50] sm:$0xff]  ;;  %v95_v14 = vld [vmem:[%s1860_s1 + $0x48] sm:$0xff]  ;;  %v1407_v15 = vld [vmem:[%s1861_s0] sm:$0xff] }
   0x7   :  { %1070 = vmatpush3.msra.mxu1 %v99_v6  ;;  %1024 = vmatprep.subr.mxu0 %v1302_v0  ;;  %v814_v16 = vld [vmem:[%s1862_s3] ss:$0 sm:$0xff]  ;;  %v34_v17 = vmax.f32 %v1407_v15, 0.0  ;;  %v827_v22 = vld [vmem:[%s1860_s1 + $0xb8] sm:$0xff]  ;;  %v1435_v24 = vld [vmem:[%s1861_s0 + $0x8] sm:$0xff] }
   0x8   :  { %1071 = vmatprep.subr.mxu1 %v1302_v0  ;;  %1025 = vmatpush3.msra.mxu0 %v832_v7  ;;  %v828_v18 = vld [vmem:[%s1860_s1 + $0xc0] sm:$0xff]  ;;  %v93_v23 = vld [vmem:[%s1860_s1 + $0x38] sm:$0xff]  ;;  %v35_v26 = vmax.f32 %v1435_v24, 0.0  ;;  %v1443_v27 = vld [vmem:[%s1861_s0 + $0x10] sm:$0xff] }
   0x9   :  { %1072 = vmatpush3.msra.mxu1 %v98_v8  ;;  %1026 = vmatprep.subr.mxu0 %v1302_v0  ;;  %v94_v19 = vld [vmem:[%s1860_s1 + $0x40] sm:$0xff]  ;;  %v43_v21 = vmul.f32 %v814_v16, %v34_v17  ;;  %v826_v28 = vld [vmem:[%s1860_s1 + $0xb0] sm:$0xff]  ;;  %v59_v30 = vmax.f32 %v1443_v27, 0.0  ;;  %v1457_v31 = vld [vmem:[%s1861_s0 + $0x18] sm:$0xff] }
   0xa   :  { %1073 = vmatprep.subr.mxu1 %v1302_v0  ;;  %1027 = vmatpush3.msra.mxu0 %v831_v9  ;;  %v815_v20 = vld [vmem:[%s1863_s4] ss:$0 sm:$0xff]  ;;  %v92_v29 = vld [vmem:[%s1860_s1 + $0x30] sm:$0xff]  ;;  %v44_v32 = vmul.f32 %v814_v16, %v35_v26  ;;  %v60_v33 = vmax.f32 %v1457_v31, 0.0  ;;  %v825_v34 = vld [vmem:[%s1860_s1 + $0xa8] sm:$0xff] }
   0xb   :  { %1074 = vmatpush3.msra.mxu1 %v97_v10  ;;  %1028 = vmatprep.subr.mxu0 %v1302_v0  ;;  %v1437_v25 = vadd.f32 %v815_v20, %v43_v21  ;;  %v91_v35 = vld [vmem:[%s1860_s1 + $0x28] sm:$0xff]  ;;  %v68_v36 = vmul.f32 %v814_v16, %v59_v30  ;;  %v824_v39 = vld [vmem:[%s1860_s1 + $0xa0] sm:$0xff]  ;;  %v823_v43 = vld [vmem:[%s1860_s1 + $0x98] sm:$0xff] }
   0xc   :  { %1075 = vmatprep.subr.mxu1 %v1302_v0  ;;  %1029 = vmatpush3.msra.mxu0 %v830_v11  ;;  %v53_v37 = vadd.f32 %v815_v20, %v44_v32  ;;  %v69_v38 = vmul.f32 %v814_v16, %v60_v33  ;;  %v90_v40 = vld [vmem:[%s1860_s1 + $0x20] sm:$0xff]  ;;  %v89_v44 = vld [vmem:[%s1860_s1 + $0x18] sm:$0xff]  ;;  %v822_v45 = vld [vmem:[%s1860_s1 + $0x90] sm:$0xff] }
   0xd   :  { %1076 = vmatpush3.msra.mxu1 %v96_v12  ;;  %1030 = vmatprep.subr.mxu0 %v1302_v0  ;;  %54 = vst [vmem:[#allocation2 + $0x8] sm:$0xff] %v1437_v25  ;;  %v1477_v41 = vadd.f32 %v815_v20, %v68_v36  ;;  %v88_v46 = vld [vmem:[%s1860_s1 + $0x10] sm:$0xff]  ;;  %v821_v47 = vld [vmem:[%s1860_s1 + $0x88] sm:$0xff]  ;;  %v820_v49 = vld [vmem:[%s1860_s1 + $0x80] sm:$0xff] }
   0xe   :  { %1077 = vmatprep.subr.mxu1 %v1302_v0  ;;  %1031 = vmatpush3.msra.mxu0 %v829_v13  ;;  %55 = vst [vmem:[#allocation2 + $0x10] sm:$0xff] %v53_v37  ;;  %v1479_v42 = vadd.f32 %v815_v20, %v69_v38  ;;  %v87_v48 = vld [vmem:[%s1860_s1 + $0x8] sm:$0xff]  ;;  %v86_v50 = vld [vmem:[%s1860_s1] sm:$0xff]  ;;  %v851_v52 = vld [vmem:[%s1860_s1 + $0x178] sm:$0xff] }
   0xf   :  { %1078 = vmatpush3.msra.mxu1 %v95_v14  ;;  %1032 = vmatprep.subr.mxu0 %v1302_v0  ;;  %79 = vst [vmem:[#allocation2 + $0x20] sm:$0xff] %v1477_v41  ;;  %v850_v53 = vld [vmem:[%s1860_s1 + $0x170] sm:$0xff]  ;;  %v849_v54 = vld [vmem:[%s1860_s1 + $0x168] sm:$0xff]  ;;  %v848_v56 = vld [vmem:[%s1860_s1 + $0x160] sm:$0xff] }
  0x10   :  { %1079 = vmatprep.subr.mxu1 %v1302_v0  ;;  %1033 = vmatpush3.msra.mxu0 %v828_v18  ;;  %80 = vst [vmem:[#allocation2 + $0x28] sm:$0xff] %v1479_v42  ;;  %v847_v57 = vld [vmem:[%s1860_s1 + $0x158] sm:$0xff]  ;;  %v846_v59 = vld [vmem:[%s1860_s1 + $0x150] sm:$0xff]  ;;  %v845_v60 = vld [vmem:[%s1860_s1 + $0x148] sm:$0xff] }
  0x11   :  { %1080 = vmatpush3.msra.mxu1 %v94_v19  ;;  %1034 = vmatprep.subr.mxu0 %v1302_v0  ;;  %v844_v62 = vld [vmem:[%s1860_s1 + $0x140] sm:$0xff]  ;;  %v843_v63 = vld [vmem:[%s1860_s1 + $0x138] sm:$0xff]  ;;  %v842_v2 = vld [vmem:[%s1860_s1 + $0x130] sm:$0xff] }
  0x12   :  { %1081 = vmatprep.subr.mxu1 %v1302_v0  ;;  %1035 = vmatpush3.msra.mxu0 %v827_v22  ;;  %v841_v3 = vld [vmem:[%s1860_s1 + $0x128] sm:$0xff]  ;;  %v840_v4 = vld [vmem:[%s1860_s1 + $0x120] sm:$0xff]  ;;  %v839_v5 = vld [vmem:[%s1860_s1 + $0x118] sm:$0xff] }
  0x13   :  { %1082 = vmatpush3.msra.mxu1 %v93_v23  ;;  %1036 = vmatprep.subr.mxu0 %v1302_v0  ;;  %v838_v6 = vld [vmem:[%s1860_s1 + $0x110] sm:$0xff]  ;;  %v837_v7 = vld [vmem:[%s1860_s1 + $0x108] sm:$0xff]  ;;  %v836_v8 = vld [vmem:[%s1860_s1 + $0x100] sm:$0xff] }
  0x14   :  { %1083 = vmatprep.subr.mxu1 %v1302_v0  ;;  %1037 = vmatpush3.msra.mxu0 %v826_v28  ;;  %v81_v51 = vld [vmem:[#allocation2 + $0x7] sm:$0xff]  ;;  %v871_v14 = vld [vmem:[%s1864_s2 + $0xf8] sm:$0xff]  ;;  %v870_v17 = vld [vmem:[%s1864_s2 + $0xf0] sm:$0xff] }
  0x15   :  { %1084 = vmatpush3.msra.mxu1 %v92_v29  ;;  %1038 = vmatprep.subr.mxu0 %v1302_v0  ;;  %v82_v55 = vld [vmem:[#allocation2 + $0xf] sm:$0xff]  ;;  %v83_v58 = vld [vmem:[#allocation2 + $0x17] sm:$0xff]  ;;  %v868_v21 = vld [vmem:[%s1864_s2 + $0xe0] sm:$0xff] }
  0x16   :  { %1085 = vmatprep.subr.mxu1 %v1302_v0  ;;  %1039 = vmatpush3.msra.mxu0 %v825_v34  ;;  %v84_v61 = vld [vmem:[#allocation2 + $0x1f] sm:$0xff]  ;;  %v302_v9 = vld [vmem:[#allocation2 + $0x9] sm:$0xff]  ;;  %v303_v10 = vld [vmem:[#allocation2 + $0x11] sm:$0xff] }
  0x17   :  { %1086 = vmatpush3.msra.mxu1 %v91_v35  ;;  %1040 = vmatprep.subr.mxu0 %v1302_v0  ;;  %v85_v1 = vld [vmem:[#allocation2 + $0x27] sm:$0xff]  ;;  %v304_v11 = vld [vmem:[#allocation2 + $0x19] sm:$0xff]  ;;  %v480_v18 = vld [vmem:[%s1864_s2 + $0x70] sm:$0xff] }
  0x18   :  { %1087 = vmatprep.subr.mxu1 %v1302_v0  ;;  %1041 = vmatpush3.msra.mxu0 %v824_v39  ;;  %v305_v12 = vld [vmem:[#allocation2 + $0x21] sm:$0xff]  ;;  %v306_v13 = vld [vmem:[#allocation2 + $0x29] sm:$0xff]  ;;  %v481_v16 = vld [vmem:[%s1864_s2 + $0x78] sm:$0xff] }
  0x19   :  { %1088 = vmatpush3.msra.mxu1 %v90_v40  ;;  %1042 = vmatprep.subr.mxu0 %v1302_v0  ;;  %v869_v19 = vld [vmem:[%s1864_s2 + $0xe8] sm:$0xff]  ;;  %v478_v22 = vld [vmem:[%s1864_s2 + $0x60] sm:$0xff]  ;;  %v867_v23 = vld [vmem:[%s1864_s2 + $0xd8] sm:$0xff] }
  0x1a   :  { %1089 = vmatprep.subr.mxu1 %v1302_v0  ;;  %1043 = vmatpush3.msra.mxu0 %v823_v43  ;;  %v479_v20 = vld [vmem:[%s1864_s2 + $0x68] sm:$0xff]  ;;  %v866_v26 = vld [vmem:[%s1864_s2 + $0xd0] sm:$0xff]  ;;  %v864_v32 = vld [vmem:[%s1864_s2 + $0xc0] sm:$0xff] }
  0x1b   :  { %1090 = vmatpush3.msra.mxu1 %v89_v44  ;;  %1044 = vmatprep.subr.mxu0 %v1302_v0  ;;  %v476_v28 = vld [vmem:[%s1864_s2 + $0x50] sm:$0xff]  ;;  %v865_v29 = vld [vmem:[%s1864_s2 + $0xc8] sm:$0xff]  ;;  %v863_v33 = vld [vmem:[%s1864_s2 + $0xb8] sm:$0xff] }
  0x1c   :  { %1091 = vmatprep.subr.mxu1 %v1302_v0  ;;  %1045 = vmatpush3.msra.mxu0 %v822_v45  ;;  %v475_v30 = vld [vmem:[%s1864_s2 + $0x48] sm:$0xff]  ;;  %v862_v34 = vld [vmem:[%s1864_s2 + $0xb0] sm:$0xff]  ;;  %v860_v36 = vld [vmem:[%s1864_s2 + $0xa0] sm:$0xff] }
  0x1d   :  { %1092 = vmatpush3.msra.mxu1 %v88_v46  ;;  %1046 = vmatprep.subr.mxu0 %v1302_v0  ;;  %v861_v35 = vld [vmem:[%s1864_s2 + $0xa8] sm:$0xff]  ;;  %v859_v38 = vld [vmem:[%s1864_s2 + $0x98] sm:$0xff]  ;;  %v858_v40 = vld [vmem:[%s1864_s2 + $0x90] sm:$0xff] }
  0x1e   :  { %1093 = vmatprep.subr.mxu1 %v1302_v0  ;;  %1047 = vmatpush3.msra.mxu0 %v821_v47  ;;  %v473_v39 = vld [vmem:[%s1864_s2 + $0x38] sm:$0xff]  ;;  %v471_v43 = vld [vmem:[%s1864_s2 + $0x28] sm:$0xff]  ;;  %v856_v44 = vld [vmem:[%s1864_s2 + $0x80] sm:$0xff] }
  0x1f   :  { %1094 = vmatpush3.msra.mxu1 %v87_v48  ;;  %1048 = vmatprep.subr.mxu0 %v1302_v0  ;;  %v470_v45 = vld [vmem:[%s1864_s2 + $0x20] sm:$0xff]  ;;  %v469_v46 = vld [vmem:[%s1864_s2 + $0x18] sm:$0xff]  ;;  %v468_v47 = vld [vmem:[%s1864_s2 + $0x10] sm:$0xff] }
  0x20   :  { %1049 = vmatpush3.msra.mxu0 %v820_v49  ;;  %1095 = vmatprep.subr.mxu1 %v1302_v0  ;;  %v467_v48 = vld [vmem:[%s1864_s2 + $0x8] sm:$0xff]  ;;  %v466_v49 = vld [vmem:[%s1864_s2] sm:$0xff] }
  0x21   :  { %1051 = vmatmul.mubr.f32.vlgmr.msra.gmra.mxu0 %v1437_v25  ;;  %1096 = vmatpush3.msra.mxu1 %v86_v50  ;;  %v477_v25 = vld [vmem:[%s1864_s2 + $0x58] sm:$0xff] }
  0x22   :  { %1097 = vmatprep.mubr.msk.f32.mxu1 %vm1303_vm0, %v1302_v0  ;;  %1112 = vmatprep.subr.mxu0 %v1302_v0 }
  0x23   :  { %1098 = vmatmul.mubr.f32.vlgmr.msra.gmra.mxu1 %v81_v51  ;;  %1113 = vmatpush3.msra.mxu0 %v851_v52 }
  0x24   :  { %1114 = vmatprep.subr.mxu0 %v1302_v0  ;;  %1053 = vmatprep.mubr.msk.f32.mxu0 %vm1303_vm0, %v1302_v0 }
  0x25   :  { %1115 = vmatpush3.msra.mxu0 %v850_v53  ;;  %1100 = vmatprep.mubr.msk.f32.mxu1 %vm1303_vm0, %v1302_v0 }
  0x26   :  { %1116 = vmatprep.subr.mxu0 %v1302_v0  ;;  %1054 = vmatmul.mubr.f32.gmra.mxu0 %v53_v37  ;;  %v474_v37 = vld [vmem:[%s1864_s2 + $0x40] sm:$0xff] }
  0x27   :  { %1117 = vmatpush3.msra.mxu0 %v849_v54  ;;  %1101 = vmatmul.mubr.f32.gmra.mxu1 %v82_v55 }
  0x28   :  { %1118 = vmatprep.subr.mxu0 %v1302_v0  ;;  %1056 = vmatprep.mubr.msk.f32.mxu0 %vm1303_vm0, %v1302_v0 }
  0x29   :  { %1119 = vmatpush3.msra.mxu0 %v848_v56  ;;  %1103 = vmatprep.mubr.msk.f32.mxu1 %vm1303_vm0, %v1302_v0 }
  0x2a   :  { %1120 = vmatprep.subr.mxu0 %v1302_v0  ;;  %1057 = vmatmul.mubr.f32.gmra.mxu0 %v1302_v0 }
  0x2b   :  { %1121 = vmatpush3.msra.mxu0 %v847_v57  ;;  %1104 = vmatmul.mubr.f32.gmra.mxu1 %v83_v58 }
  0x2c   :  { %1122 = vmatprep.subr.mxu0 %v1302_v0  ;;  %1059 = vmatprep.mubr.msk.f32.mxu0 %vm1303_vm0, %v1302_v0 }
  0x2d   :  { %1123 = vmatpush3.msra.mxu0 %v846_v59  ;;  %1106 = vmatprep.mubr.msk.f32.mxu1 %vm1303_vm0, %v1302_v0 }
  0x2e   :  { %1124 = vmatprep.subr.mxu0 %v1302_v0  ;;  %1060 = vmatmul.mubr.f32.gmra.mxu0 %v1477_v41  ;;  %v472_v41 = vld [vmem:[%s1864_s2 + $0x30] sm:$0xff] }
  0x2f   :  { %1125 = vmatpush3.msra.mxu0 %v845_v60  ;;  %1107 = vmatmul.mubr.f32.gmra.mxu1 %v84_v61 }
  0x30   :  { %1126 = vmatprep.subr.mxu0 %v1302_v0  ;;  %1062 = vmatprep.mubr.msk.f32.mxu0 %vm1303_vm0, %v1302_v0 }
  0x31   :  { %1127 = vmatpush3.msra.mxu0 %v844_v62  ;;  %1109 = vmatprep.mubr.msk.f32.mxu1 %vm1303_vm0, %v1302_v0 }
  0x32   :  { %1128 = vmatprep.subr.mxu0 %v1302_v0  ;;  %1063 = vmatmul.mubr.f32.gmra.mxu0 %v1479_v42  ;;  %v857_v42 = vld [vmem:[%s1864_s2 + $0x88] sm:$0xff] }
  0x33   :  { %1129 = vmatpush3.msra.mxu0 %v843_v63  ;;  %1110 = vmatmul.mubr.f32.gmra.mxu1 %v85_v1 }
  0x34   :  { %1130 = vmatprep.subr.mxu0 %v1302_v0  ;;  %1144 = vmatprep.mubr.msk.f32.mxu0 %vm1303_vm0, %v1302_v0 }
  0x35   :  { %1131 = vmatpush3.msra.mxu0 %v842_v2  ;;  %1159 = vmatprep.subr.mxu1 %v1302_v0 }
  0x36   :  { %1132 = vmatprep.subr.mxu0 %v1302_v0  ;;  %1191 = vmatprep.mubr.msk.f32.mxu1 %vm1303_vm0, %v1302_v0 }
  0x37   :  { %1133 = vmatpush3.msra.mxu0 %v841_v3  ;;  %1160 = vmatpush3.msra.mxu1 %v871_v14  ;;  %v853_v14 = vld [vmem:[%s1866_s6] ss:$0 sm:$0xff] }
  0x38   :  { %1134 = vmatprep.subr.mxu0 %v1302_v0  ;;  %1161 = vmatprep.subr.mxu1 %v1302_v0 }
  0x39   :  { %1135 = vmatpush3.msra.mxu0 %v840_v4  ;;  %1162 = vmatpush3.msra.mxu1 %v870_v17 }
  0x3a   :  { %1136 = vmatprep.subr.mxu0 %v1302_v0  ;;  %1163 = vmatprep.subr.mxu1 %v1302_v0 }
  0x3b   :  { %1137 = vmatpush3.msra.mxu0 %v839_v5  ;;  %1164 = vmatpush3.msra.mxu1 %v869_v19 }
  0x3c   :  { %1138 = vmatprep.subr.mxu0 %v1302_v0  ;;  %1165 = vmatprep.subr.mxu1 %v1302_v0 }
  0x3d   :  { %1139 = vmatpush3.msra.mxu0 %v838_v6  ;;  %1166 = vmatpush3.msra.mxu1 %v868_v21 }
  0x3e   :  { %1140 = vmatprep.subr.mxu0 %v1302_v0  ;;  %1167 = vmatprep.subr.mxu1 %v1302_v0 }
  0x3f   :  { %1141 = vmatpush3.msra.mxu0 %v837_v7  ;;  %1168 = vmatpush3.msra.mxu1 %v867_v23 }
  0x40   :  { %1142 = vmatprep.subr.mxu0 %v1302_v0  ;;  %1169 = vmatprep.subr.mxu1 %v1302_v0 }
  0x41   :  { %1143 = vmatpush3.msra.mxu0 %v836_v8  ;;  %1170 = vmatpush3.msra.mxu1 %v866_v26  ;;  %v886_v26 = vld [vmem:[%s1864_s2 + $0x170] sm:$0xff] }
  0x42   :  { %1145 = vmatmul.mubr.f32.vlgmr.msra.gmra.mxu0 %v302_v9  ;;  %1206 = vmatprep.subr.mxu0 %v1302_v0 }
  0x43   :  { %1147 = vmatprep.mubr.msk.f32.mxu0 %vm1303_vm0, %v1302_v0  ;;  %1207 = vmatpush3.msra.mxu0 %v481_v16 }
  0x44   :  { %1208 = vmatprep.subr.mxu0 %v1302_v0  ;;  %1171 = vmatprep.subr.mxu1 %v1302_v0 }
  0x45   :  { %1209 = vmatpush3.msra.mxu0 %v480_v18  ;;  %1172 = vmatpush3.msra.mxu1 %v865_v29 }
  0x46   :  { %1148 = vmatmul.mubr.f32.gmra.mxu0 %v303_v10  ;;  %1210 = vmatprep.subr.mxu0 %v1302_v0  ;;  %v852_v10 = vld [vmem:[%s1865_s5] ss:$0 sm:$0xff] }
  0x47   :  { %1150 = vmatprep.mubr.msk.f32.mxu0 %vm1303_vm0, %v1302_v0  ;;  %1211 = vmatpush3.msra.mxu0 %v479_v20 }
  0x48   :  { %1212 = vmatprep.subr.mxu0 %v1302_v0  ;;  %1173 = vmatprep.subr.mxu1 %v1302_v0 }
  0x49   :  { %1213 = vmatpush3.msra.mxu0 %v478_v22  ;;  %1174 = vmatpush3.msra.mxu1 %v864_v32  ;;  %v887_v22 = vld [vmem:[%s1864_s2 + $0x178] sm:$0xff]  ;;  %v885_v32 = vld [vmem:[%s1864_s2 + $0x168] sm:$0xff] }
  0x4a   :  { %1151 = vmatmul.mubr.f32.gmra.mxu0 %v304_v11  ;;  %1214 = vmatprep.subr.mxu0 %v1302_v0 }
  0x4b   :  { %1153 = vmatprep.mubr.msk.f32.mxu0 %vm1303_vm0, %v1302_v0  ;;  %1215 = vmatpush3.msra.mxu0 %v477_v25 }
  0x4c   :  { %1216 = vmatprep.subr.mxu0 %v1302_v0  ;;  %1175 = vmatprep.subr.mxu1 %v1302_v0 }
  0x4d   :  { %1217 = vmatpush3.msra.mxu0 %v476_v28  ;;  %1176 = vmatpush3.msra.mxu1 %v863_v33 }
  0x4e   :  { %1154 = vmatmul.mubr.f32.gmra.mxu0 %v305_v12  ;;  %1218 = vmatprep.subr.mxu0 %v1302_v0 }
  0x4f   :  { %1156 = vmatprep.mubr.msk.f32.mxu0 %vm1303_vm0, %v1302_v0  ;;  %1219 = vmatpush3.msra.mxu0 %v475_v30 }
  0x50   :  { %1220 = vmatprep.subr.mxu0 %v1302_v0  ;;  %1177 = vmatprep.subr.mxu1 %v1302_v0 }
  0x51   :  { %1178 = vmatpush3.msra.mxu1 %v862_v34  ;;  %1221 = vmatpush3.msra.mxu0 %v474_v37 }
  0x52   :  { %1157 = vmatmul.mubr.f32.gmra.mxu0 %v306_v13  ;;  %1179 = vmatprep.subr.mxu1 %v1302_v0 }
  0x53   :  { %1238 = vmatprep.mubr.msk.f32.mxu0 %vm1303_vm0, %v1302_v0  ;;  %1180 = vmatpush3.msra.mxu1 %v861_v35  ;;  %v884_v35 = vld [vmem:[%s1864_s2 + $0x160] sm:$0xff] }
  0x54   :  { %1181 = vmatprep.subr.mxu1 %v1302_v0  ;;  %1222 = vmatprep.subr.mxu0 %v1302_v0 }
  0x55   :  { %1182 = vmatpush3.msra.mxu1 %v860_v36  ;;  %1223 = vmatpush3.msra.mxu0 %v473_v39 }
  0x56   :  { %1183 = vmatprep.subr.mxu1 %v1302_v0  ;;  %1224 = vmatprep.subr.mxu0 %v1302_v0 }
  0x57   :  { %1184 = vmatpush3.msra.mxu1 %v859_v38  ;;  %1225 = vmatpush3.msra.mxu0 %v472_v41  ;;  %v883_v41 = vld [vmem:[%s1864_s2 + $0x158] sm:$0xff] }
  0x58   :  { %1185 = vmatprep.subr.mxu1 %v1302_v0  ;;  %1226 = vmatprep.subr.mxu0 %v1302_v0 }
  0x59   :  { %1186 = vmatpush3.msra.mxu1 %v858_v40  ;;  %1227 = vmatpush3.msra.mxu0 %v471_v43 }
  0x5a   :  { %1187 = vmatprep.subr.mxu1 %v1302_v0  ;;  %1228 = vmatprep.subr.mxu0 %v1302_v0 }
  0x5b   :  { %1188 = vmatpush3.msra.mxu1 %v857_v42  ;;  %1229 = vmatpush3.msra.mxu0 %v470_v45  ;;  %v882_v45 = vld [vmem:[%s1864_s2 + $0x150] sm:$0xff] }
  0x5c   :  { %1189 = vmatprep.subr.mxu1 %v1302_v0  ;;  %1230 = vmatprep.subr.mxu0 %v1302_v0 }
  0x5d   :  { %1190 = vmatpush3.msra.mxu1 %v856_v44  ;;  %1231 = vmatpush3.msra.mxu0 %v469_v46 }
  0x5e   :  { %1253 = vmatprep.subr.mxu1 %v1302_v0  ;;  %1232 = vmatprep.subr.mxu0 %v1302_v0 }
  0x5f   :  { %1233 = vmatpush3.msra.mxu0 %v468_v47 }
  0x60   :  { %1234 = vmatprep.subr.mxu0 %v1302_v0 }
  0x61   :  { %1235 = vmatpush3.msra.mxu0 %v467_v48 }
  0x62   :  { %1236 = vmatprep.subr.mxu0 %v1302_v0 }
  0x63   :  { %1237 = vmatpush3.msra.mxu0 %v466_v49 }
  0xe1   :  { %v190_v50 = vpop.f32.mrf.mxu0 }
  0xe3   :  { %v279_v51 = vpop.f32.mrf.mxu1  ;;  %v1052_v52 = vpop.f32.mrf.mxu0 }
  0xe4   :  { %v280_v7 = vadd.f32 %v279_v51, %v190_v50  ;;  %v881_v50 = vld [vmem:[%s1864_s2 + $0x148] sm:$0xff]  ;;  %v880_v52 = vld [vmem:[%s1864_s2 + $0x140] sm:$0xff] }
  0xe5   :  { %v1099_v53 = vpop.f32.mrf.mxu1 }
  0xe6   :  { %v195_v54 = vpop.f32.mrf.mxu0 }
  0xe7   :  { %v284_v55 = vpop.f32.mrf.mxu1 }
  0xe8   :  { %v1055_v56 = vpop.f32.mrf.mxu0  ;;  %v285_v12 = vadd.f32 %v284_v55, %v195_v54  ;;  %v879_v54 = vld [vmem:[%s1864_s2 + $0x138] sm:$0xff]  ;;  %v878_v55 = vld [vmem:[%s1864_s2 + $0x130] sm:$0xff] }
  0xe9   :  { %v1102_v57 = vpop.f32.mrf.mxu1 }
  0xea   :  { %v200_v58 = vpop.f32.mrf.mxu0  ;;  %v877_v57 = vld [vmem:[%s1864_s2 + $0x128] sm:$0xff] }
  0xeb   :  { %v289_v59 = vpop.f32.mrf.mxu1  ;;  %v876_v58 = vld [vmem:[%s1864_s2 + $0x120] sm:$0xff] }
  0xec   :  { %v1058_v60 = vpop.f32.mrf.mxu0 }
  0xed   :  { %v1105_v61 = vpop.f32.mrf.mxu1  ;;  %v875_v60 = vld [vmem:[%s1864_s2 + $0x118] sm:$0xff] }
  0xee   :  { %v204_v62 = vpop.f32.mrf.mxu0  ;;  %v874_v61 = vld [vmem:[%s1864_s2 + $0x110] sm:$0xff] }
  0xef   :  { %v293_v63 = vpop.f32.mrf.mxu1 }
  0xf0   :  { %v1061_v1 = vpop.f32.mrf.mxu0  ;;  %v294_v29 = vadd.f32 %v293_v63, %v204_v62  ;;  %v873_v62 = vld [vmem:[%s1864_s2 + $0x108] sm:$0xff]  ;;  %v872_v63 = vld [vmem:[%s1864_s2 + $0x100] sm:$0xff] }
  0xf1   :  { %v1108_v2 = vpop.f32.mrf.mxu1 }
  0xf2   :  { %v209_v3 = vpop.f32.mrf.mxu0 }
  0xf3   :  { %v298_v4 = vpop.f32.mrf.mxu1 }
  0xf4   :  { %v1064_v5 = vpop.f32.mrf.mxu0  ;;  %v299_v37 = vadd.f32 %v298_v4, %v209_v3 }
  0xf5   :  { %v1111_v6 = vpop.f32.mrf.mxu1 }
 0x102   :  { %v390_v8 = vpop.f32.mrf.mxu0 }
 0x103   :  { %v413_v9 = vadd.f32 %v390_v8, %v280_v7 }
 0x104   :  { %v1146_v11 = vpop.f32.mrf.mxu0 }
 0x105   :  { %v417_v13 = vmax.f32 %v413_v9, 0.0 }
 0x106   :  { %v395_v16 = vpop.f32.mrf.mxu0 }
 0x107   :  { %v426_v17 = vmul.f32 %v852_v10, %v417_v13  ;;  %v414_v18 = vadd.f32 %v395_v16, %v285_v12 }
 0x108   :  { %v1149_v19 = vpop.f32.mrf.mxu0 }
 0x109   :  { %v435_v20 = vadd.f32 %v853_v14, %v426_v17  ;;  %v418_v21 = vmax.f32 %v414_v18, 0.0 }
 0x10a   :  { %v400_v23 = vpop.f32.mrf.mxu0 }
 0x10b   :  { %437 = vst [vmem:[#allocation3 + $0x8] sm:$0xff] %v435_v20  ;;  %v427_v25 = vmul.f32 %v852_v10, %v418_v21  ;;  %1192 = vmatmul.mubr.f32.vlgmr.msra.gmra.mxu1 %v435_v20 }
 0x10c   :  { %v1152_v28 = vpop.f32.mrf.mxu0  ;;  %1254 = vmatpush3.msra.mxu1 %v887_v22  ;;  %1194 = vmatprep.mubr.msk.f32.mxu1 %vm1303_vm0, %v1302_v0 }
 0x10d   :  { %v436_v30 = vadd.f32 %v853_v14, %v427_v25  ;;  %1255 = vmatprep.subr.mxu1 %v1302_v0 }
 0x10e   :  { %v404_v33 = vpop.f32.mrf.mxu0  ;;  %1256 = vmatpush3.msra.mxu1 %v886_v26 }
 0x10f   :  { %438 = vst [vmem:[#allocation3 + $0x10] sm:$0xff] %v436_v30  ;;  %v415_v34 = vadd.f32 %v404_v33, %v294_v29  ;;  %1257 = vmatprep.subr.mxu1 %v1302_v0  ;;  %1195 = vmatmul.mubr.f32.gmra.mxu1 %v436_v30 }
 0x110   :  { %v1155_v36 = vpop.f32.mrf.mxu0  ;;  %1258 = vmatpush3.msra.mxu1 %v885_v32  ;;  %1197 = vmatprep.mubr.msk.f32.mxu1 %vm1303_vm0, %v1302_v0 }
 0x111   :  { %v439_v38 = vmax.f32 %v415_v34, 0.0  ;;  %1259 = vmatprep.subr.mxu1 %v1302_v0 }
 0x112   :  { %v409_v39 = vpop.f32.mrf.mxu0  ;;  %v461_v40 = vld [vmem:[#allocation3 + $0x7] sm:$0xff]  ;;  %1260 = vmatpush3.msra.mxu1 %v884_v35 }
 0x113   :  { %v448_v42 = vmul.f32 %v852_v10, %v439_v38  ;;  %v416_v43 = vadd.f32 %v409_v39, %v299_v37  ;;  %1239 = vmatmul.mubr.f32.vlgmr.msra.gmra.mxu0 %v461_v40  ;;  %1261 = vmatprep.subr.mxu1 %v1302_v0 }
 0x114   :  { %1241 = vmatprep.mubr.msk.f32.mxu0 %vm1303_vm0, %v1302_v0  ;;  %1198 = vmatmul.mubr.f32.gmra.mxu1 %v1302_v0  ;;  %v1158_v44 = vpop.f32.mrf.mxu0 }
 0x115   :  { %v457_v46 = vadd.f32 %v853_v14, %v448_v42  ;;  %v440_v47 = vmax.f32 %v416_v43, 0.0  ;;  %1262 = vmatpush3.msra.mxu1 %v883_v41  ;;  %1200 = vmatprep.mubr.msk.f32.mxu1 %vm1303_vm0, %v1302_v0 }
 0x116   :  { %v462_v48 = vld [vmem:[#allocation3 + $0xf] sm:$0xff]  ;;  %1263 = vmatprep.subr.mxu1 %v1302_v0  ;;  %v463_v53 = vld [vmem:[#allocation3 + $0x17] sm:$0xff] }
 0x117   :  { %459 = vst [vmem:[#allocation3 + $0x20] sm:$0xff] %v457_v46  ;;  %v449_v49 = vmul.f32 %v852_v10, %v440_v47  ;;  %1242 = vmatmul.mubr.f32.gmra.mxu0 %v462_v48  ;;  %1264 = vmatpush3.msra.mxu1 %v882_v45  ;;  %v682_v1 = vld [vmem:[#allocation3 + $0x9] sm:$0xff]  ;;  %v683_v2 = vld [vmem:[#allocation3 + $0x11] sm:$0xff] }
 0x118   :  { %1244 = vmatprep.mubr.msk.f32.mxu0 %vm1303_vm0, %v1302_v0  ;;  %1265 = vmatprep.subr.mxu1 %v1302_v0 }
 0x119   :  { %v458_v51 = vadd.f32 %v853_v14, %v449_v49  ;;  %1201 = vmatmul.mubr.f32.gmra.mxu1 %v457_v46 }
 0x11a   :  { %1266 = vmatpush3.msra.mxu1 %v881_v50  ;;  %1203 = vmatprep.mubr.msk.f32.mxu1 %vm1303_vm0, %v1302_v0 }
 0x11b   :  { %460 = vst [vmem:[#allocation3 + $0x28] sm:$0xff] %v458_v51  ;;  %1245 = vmatmul.mubr.f32.gmra.mxu0 %v463_v53  ;;  %1267 = vmatprep.subr.mxu1 %v1302_v0 }
 0x11c   :  { %1247 = vmatprep.mubr.msk.f32.mxu0 %vm1303_vm0, %v1302_v0  ;;  %1268 = vmatpush3.msra.mxu1 %v880_v52 }
 0x11d   :  { %1269 = vmatprep.subr.mxu1 %v1302_v0  ;;  %1204 = vmatmul.mubr.f32.gmra.mxu1 %v458_v51 }
 0x11e   :  { %v464_v56 = vld [vmem:[#allocation3 + $0x1f] sm:$0xff]  ;;  %1270 = vmatpush3.msra.mxu1 %v879_v54  ;;  %1285 = vmatprep.mubr.msk.f32.mxu1 %vm1303_vm0, %v1302_v0 }
 0x11f   :  { %1248 = vmatmul.mubr.f32.gmra.mxu0 %v464_v56  ;;  %1271 = vmatprep.subr.mxu1 %v1302_v0  ;;  %v684_v3 = vld [vmem:[#allocation3 + $0x19] sm:$0xff] }
 0x120   :  { %1250 = vmatprep.mubr.msk.f32.mxu0 %vm1303_vm0, %v1302_v0  ;;  %1272 = vmatpush3.msra.mxu1 %v878_v55 }
 0x121   :  { %1273 = vmatprep.subr.mxu1 %v1302_v0 }
 0x122   :  { %v465_v59 = vld [vmem:[#allocation3 + $0x27] sm:$0xff]  ;;  %1274 = vmatpush3.msra.mxu1 %v877_v57 }
 0x123   :  { %1251 = vmatmul.mubr.f32.gmra.mxu0 %v465_v59  ;;  %1275 = vmatprep.subr.mxu1 %v1302_v0  ;;  %v685_v4 = vld [vmem:[#allocation3 + $0x21] sm:$0xff]  ;;  %v686_v5 = vld [vmem:[#allocation3 + $0x29] sm:$0xff] }
 0x124   :  { %1276 = vmatpush3.msra.mxu1 %v876_v58 }
 0x125   :  { %1277 = vmatprep.subr.mxu1 %v1302_v0 }
 0x126   :  { %1278 = vmatpush3.msra.mxu1 %v875_v60 }
 0x127   :  { %1279 = vmatprep.subr.mxu1 %v1302_v0 }
 0x128   :  { %1280 = vmatpush3.msra.mxu1 %v874_v61 }
 0x129   :  { %1281 = vmatprep.subr.mxu1 %v1302_v0 }
 0x12a   :  { %1282 = vmatpush3.msra.mxu1 %v873_v62 }
 0x12b   :  { %1283 = vmatprep.subr.mxu1 %v1302_v0 }
 0x12c   :  { %1284 = vmatpush3.msra.mxu1 %v872_v63 }
 0x12d   :  { %1286 = vmatmul.mubr.f32.vlgmr.msra.gmra.mxu1 %v682_v1 }
 0x12e   :  { %1288 = vmatprep.mubr.msk.f32.mxu1 %vm1303_vm0, %v1302_v0 }
 0x131   :  { %1289 = vmatmul.mubr.f32.gmra.mxu1 %v683_v2 }
 0x132   :  { %1291 = vmatprep.mubr.msk.f32.mxu1 %vm1303_vm0, %v1302_v0 }
 0x135   :  { %1292 = vmatmul.mubr.f32.gmra.mxu1 %v684_v3 }
 0x136   :  { %1294 = vmatprep.mubr.msk.f32.mxu1 %vm1303_vm0, %v1302_v0 }
 0x139   :  { %1295 = vmatmul.mubr.f32.gmra.mxu1 %v685_v4 }
 0x13a   :  { %1297 = vmatprep.mubr.msk.f32.mxu1 %vm1303_vm0, %v1302_v0 }
 0x13d   :  { %1298 = vmatmul.mubr.f32.gmra.mxu1 %v686_v5 }
 0x1cb   :  { %v570_v6 = vpop.f32.mrf.mxu1 }
 0x1cd   :  { %v1193_v7 = vpop.f32.mrf.mxu1 }
 0x1cf   :  { %v575_v8 = vpop.f32.mrf.mxu1 }
 0x1d1   :  { %v1196_v9 = vpop.f32.mrf.mxu1 }
 0x1d3   :  { %v659_v10 = vpop.f32.mrf.mxu0 }
 0x1d4   :  { %v580_v11 = vpop.f32.mrf.mxu1  ;;  %v660_v28 = vadd.f32 %v659_v10, %v570_v6 }
 0x1d5   :  { %v1240_v12 = vpop.f32.mrf.mxu0 }
 0x1d6   :  { %v1199_v13 = vpop.f32.mrf.mxu1 }
 0x1d7   :  { %v664_v14 = vpop.f32.mrf.mxu0 }
 0x1d8   :  { %v665_v33 = vadd.f32 %v664_v14, %v575_v8 }
 0x1d9   :  { %v1243_v16 = vpop.f32.mrf.mxu0  ;;  %v584_v17 = vpop.f32.mrf.mxu1 }
 0x1db   :  { %v669_v18 = vpop.f32.mrf.mxu0  ;;  %v1202_v19 = vpop.f32.mrf.mxu1 }
 0x1dd   :  { %v1246_v20 = vpop.f32.mrf.mxu0  ;;  %v589_v21 = vpop.f32.mrf.mxu1 }
 0x1df   :  { %v673_v22 = vpop.f32.mrf.mxu0  ;;  %v1205_v23 = vpop.f32.mrf.mxu1 }
 0x1e0   :  { %v674_v41 = vadd.f32 %v673_v22, %v584_v17 }
 0x1e1   :  { %v1249_v0 = vpop.f32.mrf.mxu0 }
 0x1e3   :  { %v678_v25 = vpop.f32.mrf.mxu0 }
 0x1e5   :  { %v1252_v26 = vpop.f32.mrf.mxu0 }
 0x1ed   :  { %v770_v29 = vpop.f32.mrf.mxu1 }
 0x1ee   :  { %v793_v30 = vadd.f32 %v770_v29, %v660_v28 }
 0x1ef   :  { %v1287_v32 = vpop.f32.mrf.mxu1 }
 0x1f0   :  { %v799_v34 = vadd.f32 %v793_v30, %v1407_v15  ;;  %v679_v15 = vadd.f32 %v678_v25, %v589_v21 }
 0x1f1   :  { %v775_v35 = vpop.f32.mrf.mxu1 }
 0x1f2   :  { %801 = vst [vmem:[%s1867_s7] sm:$0xff] %v799_v34  ;;  %v794_v36 = vadd.f32 %v775_v35, %v665_v33 }
 0x1f3   :  { %v1290_v37 = vpop.f32.mrf.mxu1 }
 0x1f4   :  { %v800_v38 = vadd.f32 %v794_v36, %v1435_v24 }
 0x1f5   :  { %v780_v39 = vpop.f32.mrf.mxu1 }
 0x1f6   :  { %802 = vst [vmem:[%s1867_s7 + $0x8] sm:$0xff] %v800_v38 }
 0x1f7   :  { %v1293_v40 = vpop.f32.mrf.mxu1 }
 0x1f9   :  { %v784_v42 = vpop.f32.mrf.mxu1 }
 0x1fa   :  { %v795_v43 = vadd.f32 %v784_v42, %v674_v41 }
 0x1fb   :  { %v1296_v44 = vpop.f32.mrf.mxu1 }
 0x1fc   :  { %v805_v45 = vadd.f32 %v1443_v27, %v795_v43 }
 0x1fd   :  { %v789_v46 = vpop.f32.mrf.mxu1 }
 0x1fe   :  { %890 = vst [vmem:[%s1867_s7 + $0x10] sm:$0xff] %v805_v45  ;;  %v796_v47 = vadd.f32 %v789_v46, %v679_v15 }
 0x1ff   :  { %v1299_v24 = vpop.f32.mrf.mxu1 }
 0x200   :  { %v806_v48 = vadd.f32 %v1457_v31, %v796_v47 }
 0x202   :  { %891 = vst [vmem:[%s1867_s7 + $0x18] sm:$0xff] %v806_v48 }

</bundles_post_ra>
